<compile_context>
chip_gen: v6e
topology: v6e:2x2x1
jax: 0.10.0
libtpu: 0.0.40
codegen_flags: <defaults>
</compile_context>

<pallas_src>
import jax
import jax.numpy as jnp
from jax.experimental import pallas as pl
from jax.experimental.pallas import tpu as pltpu


# ----------------------------------------------------------------------------
# Kernel: one fused multiply per element.
#   scale_ref : VMEM (r_blk, 1)      float32 per-row scale = mult + gain[batch(row)]
#   x_ref     : VMEM (r_blk, t_blk)  input audio slab (rows = flattened B*C)
#   o_ref     : VMEM (r_blk, t_blk)  output slab
# Math runs in x.dtype (bf16-native on v6e/v7x); only the tiny (r_blk, 1)
# scale vector is cast per tile.
# ----------------------------------------------------------------------------
def _send_mix_kernel(scale_ref, x_ref, o_ref):
    x = x_ref[...]
    s = scale_ref[...].astype(x.dtype)          # (r_blk, 1) -> broadcasts over lanes
    o_ref[...] = (x * s).astype(o_ref.dtype)


def _tile_sizes(R, T, itemsize):
    """Capped, cdiv-friendly block sizes.

    Returns (r_blk, t_blk) where t_blk is a multiple of 128 (or == T) and
    r_blk is a multiple of the dtype-native packed sublane count (or == R).
    Per-tile bytes stay <= ~4 MiB (v7x-safe) and shrink further until the
    grid has >= 8 steps so pipeline ramp-up/down is amortized.
    """
    sub = 8 * max(1, 4 // itemsize)             # 8 f32, 16 bf16, 32 int8/fp8
    total = R * T * itemsize

    target = 4 << 20                            # per-tile byte budget
    while target > (256 << 10) and total // target < 8:
        target //= 2

    # Lane (time) blocking.
    if T <= 128 or T * sub * itemsize <= target:
        t_blk = T                               # full dim — always legal
    else:
        t_cap = max(128, (target // (sub * itemsize)) // 128 * 128)
        t_blk = T if t_cap >= T else t_cap      # multiple of 128 (< T)

    # Sublane (row) blocking.
    r_cap = max(sub, (target // (t_blk * itemsize)) // sub * sub)
    r_blk = R if R <= r_cap else r_cap          # full dim or multiple of `sub`
    return r_blk, t_blk


def send_proc_forward(x, gain, mult=0.5, *, min_pallas_bytes=4 << 20,
                      donate_x=False):
    """Pallas SendProc with a per-batch gain 'send' processor.

    out = x * mult + proc(x)   with   proc(x) = gain[b] * x
        = x * (mult + gain[b])        (algebraic fold; [B]-sized wrapper op)

    Args:
      x:    [B, C, T] input audio (f32 / bf16).
      gain: [B] per-batch processor gain in [0, 1].
      mult: dry-signal multiplier (python float or traced scalar).
      min_pallas_bytes: below this tensor size, use plain JAX (kernel launch
        overhead dominates; XLA fuses the trivial scale anyway).
      donate_x: alias the input buffer into the output (caller must not reuse x).
    Returns:
      [B, C, T] mixed signal, same dtype as x.
    """
    B, C, T = x.shape
    R = B * C
    itemsize = jnp.dtype(x.dtype).itemsize

    # Fold the dry mix into the per-row send gain (float32, single rounding).
    scale = jnp.asarray(mult, jnp.float32) + gain.astype(jnp.float32)      # [B]

    # Small-input fast path: fixed pallas_call overhead dominates tiny tensors.
    if R * T * itemsize < min_pallas_bytes:
        s = scale.astype(x.dtype)[:, None, None]
        return x * s

    # Flatten (B, C) -> rows so sublanes are fully packed; lane axis = time.
    x2d = x.reshape(R, T)
    scale2d = jnp.repeat(scale, C)[:, None]                                # [R, 1] f32

    r_blk, t_blk = _tile_sizes(R, T, itemsize)
    grid = (pl.cdiv(R, r_blk), pl.cdiv(T, t_blk))

    # Deterministic VMEM footprint: double-buffered x + out slabs + scale.
    tile_bytes = r_blk * t_blk * itemsize
    vmem_limit = int(min(64 << 20, max(8 << 20, 4 * tile_bytes + 8 * r_blk + (2 << 20))))

    out2d = pl.pallas_call(
        _send_mix_kernel,
        out_shape=jax.ShapeDtypeStruct((R, T), x.dtype),
        grid=grid,
        in_specs=[
            # per-row folded scale (lane dim 1 == full array dim -> legal)
            pl.BlockSpec((r_blk, 1), lambda r, t: (r, 0)),
            # lane-dense audio slab
            pl.BlockSpec((r_blk, t_blk), lambda r, t: (r, t)),
        ],
        out_specs=pl.BlockSpec((r_blk, t_blk), lambda r, t: (r, t)),
        compiler_params=pltpu.CompilerParams(
            # Both axes independent -> megacore/2-TC sharding where available.
            dimension_semantics=("parallel", "parallel"),
            vmem_limit_bytes=vmem_limit,
        ),
        cost_estimate=pl.CostEstimate(
            flops=R * T,                           # one multiply per element
            transcendentals=0,
            bytes_accessed=2 * R * T * itemsize + 4 * R,
        ),
        input_output_aliases=({1: 0} if donate_x else {}),
    )(scale2d, x2d)

    return out2d.reshape(B, C, T)


def controller(features, w, b):
    """Tiny deterministic controller: features -> norm_param in [0,1]."""
    return jax.nn.sigmoid(features @ w + b)  # [B, 1]


if __name__ == "__main__":
    key = jax.random.PRNGKey(0)
    k_x, k_f, k_w, k_b = jax.random.split(key, 4)

    B, C, T = 2, 4, 2048      # batch, channels, num_samples
    F = 16                    # controller feature size

    x = jax.random.normal(k_x, (B, C, T), dtype=jnp.float32)
    features = jax.random.normal(k_f, (B, F), dtype=jnp.float32)

    # Deterministic controller parameters (synthetic "checkpoint").
    w = 0.1 * jax.random.normal(k_w, (F, 1), dtype=jnp.float32)
    b = jnp.zeros((1,), dtype=jnp.float32)

    # norm_params for the send processor: per-batch gain in [0, 1].
    norm_params_gain = controller(features, w, b)[:, 0]   # [B]

    mult = 0.5

    # --- f32 path (force the Pallas kernel even at demo size) ---------------
    out = send_proc_forward(x, norm_params_gain, mult=mult, min_pallas_bytes=0)
    out = jax.block_until_ready(out)

    # Reference (pure JAX) — mirrors SendProc: x * mult + proc(x)
    ref = x * mult + x * norm_params_gain[:, None, None]
    assert out.shape == x.shape and out.dtype == x.dtype
    assert jnp.allclose(out, ref, atol=1e-5, rtol=1e-5)

    # --- bf16 path (dtype-native multiply, halved HBM traffic) --------------
    x_bf = x.astype(jnp.bfloat16)
    out_bf = send_proc_forward(x_bf, norm_params_gain, mult=mult,
                               min_pallas_bytes=0)
    out_bf = jax.block_until_ready(out_bf)
    assert out_bf.shape == x.shape and out_bf.dtype == jnp.bfloat16
    assert jnp.allclose(out_bf.astype(jnp.float32), ref, atol=5e-2, rtol=5e-2)

    # TODO(synk): the real `proc` is an arbitrary user nn.Module; only a
    # synthetic per-batch gain send processor is fused here.
    print("KERNEL_OK")
</pallas_src>

<mosaic_0001>
module attributes {stable_mosaic.version = 11 : i64} {
  func.func @_send_mix_kernel(%arg0: i32, %arg1: i32, %arg2: memref<8x1xf32, #tpu.memory_space<vmem>>, %arg3: memref<8x2048xf32, #tpu.memory_space<vmem>>, %arg4: memref<8x2048xf32, #tpu.memory_space<vmem>>) attributes {dimension_semantics = [#tpu.dimension_semantics<parallel>, #tpu.dimension_semantics<parallel>], iteration_bounds = array<i64: 1, 1>, scalar_prefetch = 0 : i64, scratch_operands = 0 : i64, tpu.core_type = #tpu.core_type<tc>, window_params = [{transform_indices = @transform_0, window_bounds = array<i64: 8, 1>}, {transform_indices = @transform_1, window_bounds = array<i64: 8, 2048>}, {transform_indices = @transform_2, window_bounds = array<i64: 8, 2048>}]} {
    %c0 = arith.constant 0 : index
    %c0_0 = arith.constant 0 : index
    %0 = vector.load %arg3[%c0, %c0_0] : memref<8x2048xf32, #tpu.memory_space<vmem>>, vector<8x2048xf32>
    %c0_1 = arith.constant 0 : index
    %c0_2 = arith.constant 0 : index
    %1 = vector.load %arg2[%c0_1, %c0_2] : memref<8x1xf32, #tpu.memory_space<vmem>>, vector<8x1xf32>
    %2 = vector.broadcast %1 : vector<8x1xf32> to vector<8x2048xf32>
    %3 = arith.mulf %0, %2 : vector<8x2048xf32>
    %c0_3 = arith.constant 0 : index
    %c0_4 = arith.constant 0 : index
    %4 = vector.load %arg4[%c0_3, %c0_4] : memref<8x2048xf32, #tpu.memory_space<vmem>>, vector<8x2048xf32>
    tpu.vector_store %arg4[%c0_3, %c0_4], %3 {strides = array<i32>} : memref<8x2048xf32, #tpu.memory_space<vmem>>, vector<8x2048xf32>,
    return
  }
  func.func @transform_0(%arg0: i32, %arg1: i32) -> (i32, i32) {
    %c0_i32 = arith.constant 0 : i32
    %c0_i32_0 = arith.constant 0 : i32
    return %arg0, %c0_i32 : i32, i32
  }
  func.func @transform_1(%arg0: i32, %arg1: i32) -> (i32, i32) {
    %c0_i32 = arith.constant 0 : i32
    return %arg0, %arg1 : i32, i32
  }
  func.func @transform_2(%arg0: i32, %arg1: i32) -> (i32, i32) {
    %c0_i32 = arith.constant 0 : i32
    return %arg0, %arg1 : i32, i32
  }
}

</mosaic_0001>

<bundles_post_ra>
// kernel: tpu_custom_call.1
= control target key start
LH: loop header
LB: loop body
LE: loop exit
PB: predicated region body
PF: predicated region fallthrough
CT: control target
= control target key end

     0   :  { %7 = vsyncpa [#allocation3], 0  ;;  %s168_s0 = inlined_call_operand.vmem [shape: f32[8,1], index: 0, kind: input, shape index: {}]   ;;  %s169_s1 = inlined_call_operand.hbm [shape: f32[8,2048], index: 1, kind: input, shape index: {}]   ;;  %s170_s2 = inlined_call_operand.hbm [shape: f32[8,2048], index: 2, kind: output, shape index: {}]  }
   0x1   :  { %8 = vsyncpa [#allocation4], 0  ;;  %s141_s9 = smov [#allocation2]  }
   0x2   :  { %s17_s10 = sshll.u32 %s141_s9, 4  ;;  %s18_s10 = int_to_ptr.vmem [resolvable:$true] %s17_s10 }
   0x3   :  { %s105_s11 = scalar_lea.vmem %s18_s10, 2048  ;;  %p110_p1 = scmp.lt.s32.totalorder %s18_s10, %s18_s10 }
   0x4   :  { %p106_p0 = scmp.ne.s32.totalorder %s18_s10, %s105_s11  ;;  %p111_p2 = scmp.lt.s32.totalorder %s105_s11, %s105_s11 }
   0x6   :  { %p112_p3 = por %p111_p2, %p110_p1 }
   0x8   :  { %p113_p4 = pnand %p112_p3, %p106_p0 }
   0xa   :  { %116 = shalt.err (!%p113_p4)
}
   0xb   :  { %20 = dma.hbm_to_vmem [thread:$0]  %s169_s1, 2048, %s18_s10, [#allocation3]  }
   0xc   :  { %137 = dma.done.wait [#allocation3], 2048  }
   0xd   :  { %138 = vsyncadd [#allocation3], 4294965248  ;;  %v142_v0 = vmov 0   ;;  %v40_v1 = vld [vmem:[%s168_s0] sm:$0xff]  ;;  %v25_v3 = vld [vmem:[#allocation2 + $0x8] sm:$0xff]  ;;  %s143_s0 = smov [#allocation5]  }
   0xe   :  { %96 = vset.pattern.permute.xlu0 %v142_v0  ;;  %v24_v2 = vld [vmem:[#allocation2] sm:$0xff]  ;;  %v26_v4 = vld [vmem:[#allocation2 + $0x10] sm:$0xff]  ;;  %v27_v5 = vld [vmem:[#allocation2 + $0x18] sm:$0xff]  ;;  %s84_s1 = sshll.u32 %s143_s0, 4  ;;  %s85_s1 = int_to_ptr.vmem [resolvable:$true] %s84_s1 }
   0xf   :  { %43 = vperm.xlu0 %96, %v40_v1   ;;  %v28_v6 = vld [vmem:[#allocation2 + $0x20] sm:$0xff]  ;;  %v29_v7 = vld [vmem:[#allocation2 + $0x28] sm:$0xff]  ;;  %v30_v8 = vld [vmem:[#allocation2 + $0x30] sm:$0xff]  ;;  %s117_s16 = scalar_lea.vmem %s85_s1, 2048  ;;  %p122_p6 = scmp.lt.s32.totalorder %s85_s1, %s85_s1 }
  0x10   :  { %v31_v9 = vld [vmem:[#allocation2 + $0x38] sm:$0xff]  ;;  %v32_v10 = vld [vmem:[#allocation2 + $0x40] sm:$0xff]  ;;  %v33_v11 = vld [vmem:[#allocation2 + $0x48] sm:$0xff]  ;;  %p118_p5 = scmp.ne.s32.totalorder %s85_s1, %s117_s16  ;;  %p123_p7 = scmp.lt.s32.totalorder %s117_s16, %s117_s16 }
  0x11   :  { %v34_v13 = vld [vmem:[#allocation2 + $0x50] sm:$0xff]  ;;  %v35_v14 = vld [vmem:[#allocation2 + $0x58] sm:$0xff]  ;;  %v36_v15 = vld [vmem:[#allocation2 + $0x60] sm:$0xff] }
  0x12   :  { %v37_v16 = vld [vmem:[#allocation2 + $0x68] sm:$0xff]  ;;  %v38_v17 = vld [vmem:[#allocation2 + $0x70] sm:$0xff]  ;;  %v39_v18 = vld [vmem:[#allocation2 + $0x78] sm:$0xff]  ;;  %p124_p8 = por %p123_p7, %p122_p6 }
  0x14   :  { %p125_p9 = pnand %p124_p8, %p118_p5 }
  0x8a   :  { %v44_v12 = vpop.permute.xlu0 %43 }
  0x8b   :  { %v46_v19 = vmul.f32 %v44_v12, %v24_v2  ;;  %v47_v20 = vmul.f32 %v44_v12, %v25_v3  ;;  %v48_v21 = vmul.f32 %v44_v12, %v26_v4  ;;  %v49_v22 = vmul.f32 %v44_v12, %v27_v5 }
  0x8c   :  { %v50_v23 = vmul.f32 %v44_v12, %v28_v6  ;;  %v51_v24 = vmul.f32 %v44_v12, %v29_v7  ;;  %v52_v25 = vmul.f32 %v44_v12, %v30_v8  ;;  %v53_v26 = vmul.f32 %v44_v12, %v31_v9 }
  0x8d   :  { %v54_v27 = vmul.f32 %v44_v12, %v32_v10  ;;  %v55_v28 = vmul.f32 %v44_v12, %v33_v11  ;;  %v56_v29 = vmul.f32 %v44_v12, %v34_v13  ;;  %v57_v30 = vmul.f32 %v44_v12, %v35_v14  ;;  %62 = vst [vmem:[#allocation5] sm:$0xff] %v46_v19 }
  0x8e   :  { %63 = vst [vmem:[#allocation5 + $0x8] sm:$0xff] %v47_v20  ;;  %64 = vst [vmem:[#allocation5 + $0x10] sm:$0xff] %v48_v21  ;;  %v58_v31 = vmul.f32 %v44_v12, %v36_v15  ;;  %v59_v32 = vmul.f32 %v44_v12, %v37_v16  ;;  %v60_v33 = vmul.f32 %v44_v12, %v38_v17 }
  0x8f   :  { %65 = vst [vmem:[#allocation5 + $0x18] sm:$0xff] %v49_v22  ;;  %v61_v34 = vmul.f32 %v44_v12, %v39_v18  ;;  %66 = vst [vmem:[#allocation5 + $0x20] sm:$0xff] %v50_v23 }
  0x90   :  { %67 = vst [vmem:[#allocation5 + $0x28] sm:$0xff] %v51_v24  ;;  %68 = vst [vmem:[#allocation5 + $0x30] sm:$0xff] %v52_v25 }
  0x91   :  { %69 = vst [vmem:[#allocation5 + $0x38] sm:$0xff] %v53_v26  ;;  %70 = vst [vmem:[#allocation5 + $0x40] sm:$0xff] %v54_v27 }
  0x92   :  { %71 = vst [vmem:[#allocation5 + $0x48] sm:$0xff] %v55_v28  ;;  %72 = vst [vmem:[#allocation5 + $0x50] sm:$0xff] %v56_v29 }
  0x93   :  { %73 = vst [vmem:[#allocation5 + $0x58] sm:$0xff] %v57_v30  ;;  %74 = vst [vmem:[#allocation5 + $0x60] sm:$0xff] %v58_v31 }
  0x94   :  { %75 = vst [vmem:[#allocation5 + $0x68] sm:$0xff] %v59_v32  ;;  %76 = vst [vmem:[#allocation5 + $0x70] sm:$0xff] %v60_v33 }
  0x95   :  { %77 = vst [vmem:[#allocation5 + $0x78] sm:$0xff] %v61_v34 }
  0x96   :  { %128 = shalt.err (!%p125_p9)
}
  0x97   :  { %87 = dma.vmem_to_hbm [thread:$0]  %s85_s1, 2048, %s170_s2, [#allocation4]  }
  0x98   :  { %139 = dma.done.wait [#allocation4], 2048  }
  0x99   :  { %140 = vsyncadd [#allocation4], 4294965248 }
  0x9a   :  { %91 = vsyncpa [#allocation3], 1 }
  0x9b   :  { %92 = vsyncpa [#allocation4], 1 }

</bundles_post_ra>
